<compile_context>
chip_gen: v7x
topology: tpu7x:2x2x1
jax: 0.10.0
libtpu: 0.0.40
codegen_flags: <defaults>
</compile_context>

<pallas_src>
import numpy as np
import jax
import jax.numpy as jnp
from jax import lax
from jax.experimental import pallas as pl
from jax.experimental.pallas import tpu as pltpu


def _conv_tap_masks(h, w, hc):
    """(9*hc, h*w) 0/1 mask; rows t*hc..t*hc+hc-1 mask tap t = (dy,dx)."""
    ys = np.arange(h * w) // w
    xs = np.arange(h * w) % w
    rows = []
    for dy in (-1, 0, 1):
        for dx in (-1, 0, 1):
            ok = (ys + dy >= 0) & (ys + dy < h) & (xs + dx >= 0) & (xs + dx < w)
            rows.append(ok.astype(np.float32))
    masks = np.stack(rows)                                    # (9, h*w)
    return jnp.asarray(np.repeat(masks, hc, axis=0))          # (9*hc, h*w)


def _pool_select_matrix(h, w):
    """(h*w, (h//2)*(w//2)) 0/1 matrix selecting each 2x2 block's anchor pixel."""
    hp, wp = h // 2, w // 2
    g = np.zeros((h * w, hp * wp), np.float32)
    for y2 in range(hp):
        for x2 in range(wp):
            g[(2 * y2) * w + 2 * x2, y2 * wp + x2] = 1.0
    return jnp.asarray(g)


def encoder_block_forward(x_nchw, params):
    """x_nchw: (N, C, H, W) float32. Returns (pooled_nchw, skip_nchw)."""
    s1, t1, w1, b1, s2, t2, w2, b2, s3, t3, w3, b3 = params
    N, C, H, W = x_nchw.shape
    HC = w1.shape[1]
    HW = H * W
    HP, WP = H // 2, W // 2
    assert H % 2 == 0 and W % 2 == 0

    # ---- host-side parameter packing (tiny tensors; free layout plumbing) ----
    kparams = (
        s1.T, t1.T,                                              # (C, 1)  BN1
        w1.T,                                                    # (HC, C) c1
        s2.T, (t2 + b1 * s2).T,                                  # BN2 (b1 folded)
        jnp.transpose(w2, (3, 0, 1, 2)).reshape(HC, 9 * HC),     # (HC, 9*HC) c2 im2col
        s3.T, (t3 + b2 * s3).T,                                  # BN3 (b2 folded)
        w3.T, b3.T,                                              # (C, HC), (C, 1) c3
        _conv_tap_masks(H, W, HC),                               # (9*HC, HW)
        _pool_select_matrix(H, W),                               # (HW, HP*WP)
    )

    # NCHW -> (N, C, H*W): trailing-dim collapse only, no HBM transpose.
    x2 = x_nchw.reshape(N, C, HW).astype(jnp.float32)

    def kernel(x_ref, s1_ref, t1_ref, w1_ref, s2_ref, t2_ref, w2_ref,
               s3_ref, t3_ref, w3_ref, b3_ref, msk_ref, sel_ref,
               skip_ref, pool_ref):
        x = x_ref[...]                                           # (C, HW)

        # b1: BN(folded)+ReLU ; c1: 1x1 conv = matmul over channels (lane-dense N)
        h = jnp.maximum(x * s1_ref[...] + t1_ref[...], 0.0)
        h = jnp.dot(w1_ref[...], h, preferred_element_type=jnp.float32)

        # b2: BN(folded, conv1 bias absorbed)+ReLU
        h = jnp.maximum(h * s2_ref[...] + t2_ref[...], 0.0)      # (HC, HW)

        # c2: 3x3 'same' conv as ONE im2col matmul.  Taps are lane rolls of the
        # flat (HC, H*W) slab; host masks zero out-of-image taps (this also
        # handles the row-wrap of the flattened layout).
        taps = []
        for dy in (-1, 0, 1):
            for dx in (-1, 0, 1):
                off = dy * W + dx
                taps.append(jnp.roll(h, -off, axis=1) if off != 0 else h)
        col = jnp.concatenate(taps, axis=0) * msk_ref[...]       # (9*HC, HW)
        h = jnp.dot(w2_ref[...], col, preferred_element_type=jnp.float32)

        # b3: BN(folded, conv2 bias absorbed)+ReLU ; c3: 1x1 conv back to C + b3
        h = jnp.maximum(h * s3_ref[...] + t3_ref[...], 0.0)
        h = jnp.dot(w3_ref[...], h, preferred_element_type=jnp.float32) + b3_ref[...]

        # residual add
        skip = h + x                                             # (C, HW)
        skip_ref[...] = skip

        # MaxPool2d(2), register-resident: pair-max along x (lane roll by 1),
        # pair-max along y (lane roll by W), then compact the even/even anchors
        # with a 0/1 selection matmul (exact for 0/1 weights).
        m = jnp.maximum(skip, jnp.roll(skip, -1, axis=1))
        m = jnp.maximum(m, jnp.roll(m, -W, axis=1))
        pool_ref[...] = jnp.dot(m, sel_ref[...], preferred_element_type=jnp.float32)

    grid_spec = pltpu.PrefetchScalarGridSpec(
        num_scalar_prefetch=0,
        grid=(N,),                       # one image per step; lanes = H*W
        in_specs=[pl.BlockSpec((pl.Squeezed(), C, HW), lambda n: (n, 0, 0))]
                 + [pl.BlockSpec(p.shape, lambda n: (0, 0)) for p in kparams],
        out_specs=(pl.BlockSpec((pl.Squeezed(), C, HW), lambda n: (n, 0, 0)),
                   pl.BlockSpec((pl.Squeezed(), C, HP * WP), lambda n: (n, 0, 0))),
    )

    skip2, pool2 = pl.pallas_call(
        kernel,
        out_shape=(jax.ShapeDtypeStruct((N, C, HW), jnp.float32),
                   jax.ShapeDtypeStruct((N, C, HP * WP), jnp.float32)),
        grid_spec=grid_spec,
        compiler_params=pltpu.CompilerParams(
            dimension_semantics=("parallel",),
            vmem_limit_bytes=32 * 1024 * 1024),
    )(x2, *kparams)

    # Free trailing-dim reshapes back to NCHW conventions.
    return pool2.reshape(N, C, HP, WP), skip2.reshape(N, C, H, W)


def init_params(key, in_c, h_c):
    """Deterministic synthetic parameters (shapes follow the PyTorch module)."""
    ks = jax.random.split(key, 18)
    eps = 1e-5

    def folded_bn(kg, kb, km, kv, c):
        gamma = jax.random.uniform(kg, (c,), jnp.float32, 0.5, 1.5)
        beta = 0.1 * jax.random.normal(kb, (c,), jnp.float32)
        run_mean = 0.1 * jax.random.normal(km, (c,), jnp.float32)
        run_var = jax.random.uniform(kv, (c,), jnp.float32, 0.5, 1.5)
        s = gamma * lax.rsqrt(run_var + eps)
        t = beta - run_mean * s
        return s.reshape(1, c), t.reshape(1, c)

    s1, t1 = folded_bn(ks[0], ks[1], ks[2], ks[3], in_c)
    s2, t2 = folded_bn(ks[4], ks[5], ks[6], ks[7], h_c)
    s3, t3 = folded_bn(ks[8], ks[9], ks[10], ks[11], h_c)

    # conv weights in channels-last / HWIO layouts
    w1 = 0.3 * jax.random.normal(ks[12], (in_c, h_c), jnp.float32)       # 1x1: (Cin, HC)
    b1 = 0.1 * jax.random.normal(ks[13], (1, h_c), jnp.float32)
    w2 = 0.2 * jax.random.normal(ks[14], (3, 3, h_c, h_c), jnp.float32)  # 3x3: HWIO
    b2 = 0.1 * jax.random.normal(ks[15], (1, h_c), jnp.float32)
    w3 = 0.3 * jax.random.normal(ks[16], (h_c, in_c), jnp.float32)       # 1x1: (HC, Cin)
    b3 = 0.1 * jax.random.normal(ks[17], (1, in_c), jnp.float32)

    return (s1, t1, w1, b1, s2, t2, w2, b2, s3, t3, w3, b3)


def reference_forward(x_nchw, params):
    """Pure-JAX reference of the same forward pass (for validation)."""
    s1, t1, w1, b1, s2, t2, w2, b2, s3, t3, w3, b3 = params
    x = jnp.transpose(x_nchw, (0, 2, 3, 1))
    h = jnp.maximum(x * s1 + t1, 0.0)
    h = jnp.einsum('nhwc,cd->nhwd', h, w1) + b1
    h = jnp.maximum(h * s2 + t2, 0.0)
    h = lax.conv_general_dilated(h, w2, window_strides=(1, 1), padding='SAME',
                                 dimension_numbers=('NHWC', 'HWIO', 'NHWC')) + b2
    h = jnp.maximum(h * s3 + t3, 0.0)
    h = jnp.einsum('nhwc,cd->nhwd', h, w3) + b3
    skip = h + x
    pool = lax.reduce_window(skip, -jnp.inf, lax.max,
                             window_dimensions=(1, 2, 2, 1),
                             window_strides=(1, 2, 2, 1), padding='VALID')
    return (jnp.transpose(pool, (0, 3, 1, 2)),
            jnp.transpose(skip, (0, 3, 1, 2)))


if __name__ == "__main__":
    in_c = 4
    h_c = in_c // 2
    N, H, W = 2, 16, 16

    key = jax.random.PRNGKey(0)
    kx, kp = jax.random.split(key)
    x = jax.random.normal(kx, (N, in_c, H, W), jnp.float32)
    params = init_params(kp, in_c, h_c)

    pooled, skip = encoder_block_forward(x, params)
    jax.block_until_ready((pooled, skip))

    ref_pool, ref_skip = reference_forward(x, params)
    np.testing.assert_allclose(np.asarray(pooled), np.asarray(ref_pool),
                               rtol=2e-5, atol=2e-5)
    np.testing.assert_allclose(np.asarray(skip), np.asarray(ref_skip),
                               rtol=2e-5, atol=2e-5)
    print("KERNEL_OK")
</pallas_src>

<mosaic_0001>
module attributes {stable_mosaic.version = 11 : i64} {
  func.func @kernel(%arg0: i32, %arg1: memref<1x4x256xf32, #tpu.memory_space<vmem>>, %arg2: memref<4x1xf32, #tpu.memory_space<vmem>>, %arg3: memref<4x1xf32, #tpu.memory_space<vmem>>, %arg4: memref<2x4xf32, #tpu.memory_space<vmem>>, %arg5: memref<2x1xf32, #tpu.memory_space<vmem>>, %arg6: memref<2x1xf32, #tpu.memory_space<vmem>>, %arg7: memref<2x18xf32, #tpu.memory_space<vmem>>, %arg8: memref<2x1xf32, #tpu.memory_space<vmem>>, %arg9: memref<2x1xf32, #tpu.memory_space<vmem>>, %arg10: memref<4x2xf32, #tpu.memory_space<vmem>>, %arg11: memref<4x1xf32, #tpu.memory_space<vmem>>, %arg12: memref<18x256xf32, #tpu.memory_space<vmem>>, %arg13: memref<256x64xf32, #tpu.memory_space<vmem>>, %arg14: memref<1x4x256xf32, #tpu.memory_space<vmem>>, %arg15: memref<1x4x64xf32, #tpu.memory_space<vmem>>) attributes {dimension_semantics = [#tpu.dimension_semantics<parallel>], iteration_bounds = array<i64: 2>, scalar_prefetch = 0 : i64, scratch_operands = 0 : i64, tpu.core_type = #tpu.core_type<tc>, window_params = [{transform_indices = @transform_0, window_bounds = array<i64: 1, 4, 256>}, {pipeline_mode = #tpu.pipeline_mode<synchronous>, transform_indices = @transform_1, window_bounds = array<i64: 4, 1>}, {pipeline_mode = #tpu.pipeline_mode<synchronous>, transform_indices = @transform_2, window_bounds = array<i64: 4, 1>}, {pipeline_mode = #tpu.pipeline_mode<synchronous>, transform_indices = @transform_3, window_bounds = array<i64: 2, 4>}, {pipeline_mode = #tpu.pipeline_mode<synchronous>, transform_indices = @transform_4, window_bounds = array<i64: 2, 1>}, {pipeline_mode = #tpu.pipeline_mode<synchronous>, transform_indices = @transform_5, window_bounds = array<i64: 2, 1>}, {pipeline_mode = #tpu.pipeline_mode<synchronous>, transform_indices = @transform_6, window_bounds = array<i64: 2, 18>}, {pipeline_mode = #tpu.pipeline_mode<synchronous>, transform_indices = @transform_7, window_bounds = array<i64: 2, 1>}, {pipeline_mode = #tpu.pipeline_mode<synchronous>, transform_indices = @transform_8, window_bounds = array<i64: 2, 1>}, {pipeline_mode = #tpu.pipeline_mode<synchronous>, transform_indices = @transform_9, window_bounds = array<i64: 4, 2>}, {pipeline_mode = #tpu.pipeline_mode<synchronous>, transform_indices = @transform_10, window_bounds = array<i64: 4, 1>}, {pipeline_mode = #tpu.pipeline_mode<synchronous>, transform_indices = @transform_11, window_bounds = array<i64: 18, 256>}, {pipeline_mode = #tpu.pipeline_mode<synchronous>, transform_indices = @transform_12, window_bounds = array<i64: 256, 64>}, {transform_indices = @transform_13, window_bounds = array<i64: 1, 4, 256>}, {transform_indices = @transform_14, window_bounds = array<i64: 1, 4, 64>}]} {
    %c0 = arith.constant 0 : index
    %c0_0 = arith.constant 0 : index
    %c0_1 = arith.constant 0 : index
    %0 = vector.load %arg1[%c0, %c0_0, %c0_1] : memref<1x4x256xf32, #tpu.memory_space<vmem>>, vector<1x4x256xf32>
    %1 = vector.shape_cast %0 : vector<1x4x256xf32> to vector<4x256xf32>
    %c0_2 = arith.constant 0 : index
    %c0_3 = arith.constant 0 : index
    %2 = vector.load %arg2[%c0_2, %c0_3] : memref<4x1xf32, #tpu.memory_space<vmem>>, vector<4x1xf32>
    %3 = vector.broadcast %2 : vector<4x1xf32> to vector<4x256xf32>
    %4 = arith.mulf %1, %3 : vector<4x256xf32>
    %c0_4 = arith.constant 0 : index
    %c0_5 = arith.constant 0 : index
    %5 = vector.load %arg3[%c0_4, %c0_5] : memref<4x1xf32, #tpu.memory_space<vmem>>, vector<4x1xf32>
    %6 = vector.broadcast %5 : vector<4x1xf32> to vector<4x256xf32>
    %7 = arith.addf %4, %6 : vector<4x256xf32>
    %cst = arith.constant 0.000000e+00 : f32
    %8 = vector.broadcast %cst : f32 to vector<4x256xf32>
    %9 = arith.maximumf %7, %8 : vector<4x256xf32>
    %c0_6 = arith.constant 0 : index
    %c0_7 = arith.constant 0 : index
    %10 = vector.load %arg4[%c0_6, %c0_7] : memref<2x4xf32, #tpu.memory_space<vmem>>, vector<2x4xf32>
    %cst_8 = arith.constant dense<0.000000e+00> : vector<2x256xf32>
    %11 = tpu.matmul %10, %9, %cst_8 {dimension_numbers = #tpu.dot_dimension_numbers<[1], [0], [0], [1], [0, 0, 1, 1], [], []>} : vector<2x4xf32>, vector<4x256xf32>, vector<2x256xf32> -> vector<2x256xf32>
    %c0_9 = arith.constant 0 : index
    %c0_10 = arith.constant 0 : index
    %12 = vector.load %arg5[%c0_9, %c0_10] : memref<2x1xf32, #tpu.memory_space<vmem>>, vector<2x1xf32>
    %13 = vector.broadcast %12 : vector<2x1xf32> to vector<2x256xf32>
    %14 = arith.mulf %11, %13 : vector<2x256xf32>
    %c0_11 = arith.constant 0 : index
    %c0_12 = arith.constant 0 : index
    %15 = vector.load %arg6[%c0_11, %c0_12] : memref<2x1xf32, #tpu.memory_space<vmem>>, vector<2x1xf32>
    %16 = vector.broadcast %15 : vector<2x1xf32> to vector<2x256xf32>
    %17 = arith.addf %14, %16 : vector<2x256xf32>
    %cst_13 = arith.constant 0.000000e+00 : f32
    %18 = vector.broadcast %cst_13 : f32 to vector<2x256xf32>
    %19 = arith.maximumf %17, %18 : vector<2x256xf32>
    %20 = vector.extract_strided_slice %19 {offsets = [0, 239], sizes = [2, 17], strides = [1, 1]} : vector<2x256xf32> to vector<2x17xf32>
    %21 = vector.extract_strided_slice %19 {offsets = [0, 0], sizes = [2, 239], strides = [1, 1]} : vector<2x256xf32> to vector<2x239xf32>
    %22 = tpu.concatenate %20, %21 in 1 : vector<2x17xf32>, vector<2x239xf32> -> vector<2x256xf32>
    %23 = vector.extract_strided_slice %19 {offsets = [0, 240], sizes = [2, 16], strides = [1, 1]} : vector<2x256xf32> to vector<2x16xf32>
    %24 = vector.extract_strided_slice %19 {offsets = [0, 0], sizes = [2, 240], strides = [1, 1]} : vector<2x256xf32> to vector<2x240xf32>
    %25 = tpu.concatenate %23, %24 in 1 : vector<2x16xf32>, vector<2x240xf32> -> vector<2x256xf32>
    %26 = vector.extract_strided_slice %19 {offsets = [0, 241], sizes = [2, 15], strides = [1, 1]} : vector<2x256xf32> to vector<2x15xf32>
    %27 = vector.extract_strided_slice %19 {offsets = [0, 0], sizes = [2, 241], strides = [1, 1]} : vector<2x256xf32> to vector<2x241xf32>
    %28 = tpu.concatenate %26, %27 in 1 : vector<2x15xf32>, vector<2x241xf32> -> vector<2x256xf32>
    %29 = vector.extract_strided_slice %19 {offsets = [0, 255], sizes = [2, 1], strides = [1, 1]} : vector<2x256xf32> to vector<2x1xf32>
    %30 = vector.extract_strided_slice %19 {offsets = [0, 0], sizes = [2, 255], strides = [1, 1]} : vector<2x256xf32> to vector<2x255xf32>
    %31 = tpu.concatenate %29, %30 in 1 : vector<2x1xf32>, vector<2x255xf32> -> vector<2x256xf32>
    %32 = vector.extract_strided_slice %19 {offsets = [0, 1], sizes = [2, 255], strides = [1, 1]} : vector<2x256xf32> to vector<2x255xf32>
    %33 = vector.extract_strided_slice %19 {offsets = [0, 0], sizes = [2, 1], strides = [1, 1]} : vector<2x256xf32> to vector<2x1xf32>
    %34 = tpu.concatenate %32, %33 in 1 : vector<2x255xf32>, vector<2x1xf32> -> vector<2x256xf32>
    %35 = vector.extract_strided_slice %19 {offsets = [0, 15], sizes = [2, 241], strides = [1, 1]} : vector<2x256xf32> to vector<2x241xf32>
    %36 = vector.extract_strided_slice %19 {offsets = [0, 0], sizes = [2, 15], strides = [1, 1]} : vector<2x256xf32> to vector<2x15xf32>
    %37 = tpu.concatenate %35, %36 in 1 : vector<2x241xf32>, vector<2x15xf32> -> vector<2x256xf32>
    %38 = vector.extract_strided_slice %19 {offsets = [0, 16], sizes = [2, 240], strides = [1, 1]} : vector<2x256xf32> to vector<2x240xf32>
    %39 = vector.extract_strided_slice %19 {offsets = [0, 0], sizes = [2, 16], strides = [1, 1]} : vector<2x256xf32> to vector<2x16xf32>
    %40 = tpu.concatenate %38, %39 in 1 : vector<2x240xf32>, vector<2x16xf32> -> vector<2x256xf32>
    %41 = vector.extract_strided_slice %19 {offsets = [0, 17], sizes = [2, 239], strides = [1, 1]} : vector<2x256xf32> to vector<2x239xf32>
    %42 = vector.extract_strided_slice %19 {offsets = [0, 0], sizes = [2, 17], strides = [1, 1]} : vector<2x256xf32> to vector<2x17xf32>
    %43 = tpu.concatenate %41, %42 in 1 : vector<2x239xf32>, vector<2x17xf32> -> vector<2x256xf32>
    %44 = tpu.concatenate %22, %25, %28, %31, %19, %34, %37, %40, %43 in 0 : vector<2x256xf32>, vector<2x256xf32>, vector<2x256xf32>, vector<2x256xf32>, vector<2x256xf32>, vector<2x256xf32>, vector<2x256xf32>, vector<2x256xf32>, vector<2x256xf32> -> vector<18x256xf32>
    %c0_14 = arith.constant 0 : index
    %c0_15 = arith.constant 0 : index
    %45 = vector.load %arg12[%c0_14, %c0_15] : memref<18x256xf32, #tpu.memory_space<vmem>>, vector<18x256xf32>
    %46 = arith.mulf %44, %45 : vector<18x256xf32>
    %c0_16 = arith.constant 0 : index
    %c0_17 = arith.constant 0 : index
    %47 = vector.load %arg7[%c0_16, %c0_17] : memref<2x18xf32, #tpu.memory_space<vmem>>, vector<2x18xf32>
    %cst_18 = arith.constant dense<0.000000e+00> : vector<2x256xf32>
    %48 = tpu.matmul %47, %46, %cst_18 {dimension_numbers = #tpu.dot_dimension_numbers<[1], [0], [0], [1], [0, 0, 1, 1], [], []>} : vector<2x18xf32>, vector<18x256xf32>, vector<2x256xf32> -> vector<2x256xf32>
    %c0_19 = arith.constant 0 : index
    %c0_20 = arith.constant 0 : index
    %49 = vector.load %arg8[%c0_19, %c0_20] : memref<2x1xf32, #tpu.memory_space<vmem>>, vector<2x1xf32>
    %50 = vector.broadcast %49 : vector<2x1xf32> to vector<2x256xf32>
    %51 = arith.mulf %48, %50 : vector<2x256xf32>
    %c0_21 = arith.constant 0 : index
    %c0_22 = arith.constant 0 : index
    %52 = vector.load %arg9[%c0_21, %c0_22] : memref<2x1xf32, #tpu.memory_space<vmem>>, vector<2x1xf32>
    %53 = vector.broadcast %52 : vector<2x1xf32> to vector<2x256xf32>
    %54 = arith.addf %51, %53 : vector<2x256xf32>
    %cst_23 = arith.constant 0.000000e+00 : f32
    %55 = vector.broadcast %cst_23 : f32 to vector<2x256xf32>
    %56 = arith.maximumf %54, %55 : vector<2x256xf32>
    %c0_24 = arith.constant 0 : index
    %c0_25 = arith.constant 0 : index
    %57 = vector.load %arg10[%c0_24, %c0_25] : memref<4x2xf32, #tpu.memory_space<vmem>>, vector<4x2xf32>
    %cst_26 = arith.constant dense<0.000000e+00> : vector<4x256xf32>
    %58 = tpu.matmul %57, %56, %cst_26 {dimension_numbers = #tpu.dot_dimension_numbers<[1], [0], [0], [1], [0, 0, 1, 1], [], []>} : vector<4x2xf32>, vector<2x256xf32>, vector<4x256xf32> -> vector<4x256xf32>
    %c0_27 = arith.constant 0 : index
    %c0_28 = arith.constant 0 : index
    %59 = vector.load %arg11[%c0_27, %c0_28] : memref<4x1xf32, #tpu.memory_space<vmem>>, vector<4x1xf32>
    %60 = vector.broadcast %59 : vector<4x1xf32> to vector<4x256xf32>
    %61 = arith.addf %58, %60 : vector<4x256xf32>
    %62 = arith.addf %61, %1 : vector<4x256xf32>
    %c0_29 = arith.constant 0 : index
    %c0_30 = arith.constant 0 : index
    %c0_31 = arith.constant 0 : index
    %63 = vector.load %arg14[%c0_29, %c0_30, %c0_31] : memref<1x4x256xf32, #tpu.memory_space<vmem>>, vector<1x4x256xf32>
    %64 = vector.shape_cast %63 : vector<1x4x256xf32> to vector<4x256xf32>
    %65 = vector.shape_cast %62 : vector<4x256xf32> to vector<1x4x256xf32>
    tpu.vector_store %arg14[%c0_29, %c0_30, %c0_31], %65 {strides = array<i32>} : memref<1x4x256xf32, #tpu.memory_space<vmem>>, vector<1x4x256xf32>,
    %66 = vector.extract_strided_slice %62 {offsets = [0, 1], sizes = [4, 255], strides = [1, 1]} : vector<4x256xf32> to vector<4x255xf32>
    %67 = vector.extract_strided_slice %62 {offsets = [0, 0], sizes = [4, 1], strides = [1, 1]} : vector<4x256xf32> to vector<4x1xf32>
    %68 = tpu.concatenate %66, %67 in 1 : vector<4x255xf32>, vector<4x1xf32> -> vector<4x256xf32>
    %69 = arith.maximumf %62, %68 : vector<4x256xf32>
    %70 = vector.extract_strided_slice %69 {offsets = [0, 16], sizes = [4, 240], strides = [1, 1]} : vector<4x256xf32> to vector<4x240xf32>
    %71 = vector.extract_strided_slice %69 {offsets = [0, 0], sizes = [4, 16], strides = [1, 1]} : vector<4x256xf32> to vector<4x16xf32>
    %72 = tpu.concatenate %70, %71 in 1 : vector<4x240xf32>, vector<4x16xf32> -> vector<4x256xf32>
    %73 = arith.maximumf %69, %72 : vector<4x256xf32>
    %c0_32 = arith.constant 0 : index
    %c0_33 = arith.constant 0 : index
    %74 = vector.load %arg13[%c0_32, %c0_33] : memref<256x64xf32, #tpu.memory_space<vmem>>, vector<256x64xf32>
    %cst_34 = arith.constant dense<0.000000e+00> : vector<4x64xf32>
    %75 = tpu.matmul %73, %74, %cst_34 {dimension_numbers = #tpu.dot_dimension_numbers<[1], [0], [0], [1], [0, 0, 1, 1], [], []>} : vector<4x256xf32>, vector<256x64xf32>, vector<4x64xf32> -> vector<4x64xf32>
    %c0_35 = arith.constant 0 : index
    %c0_36 = arith.constant 0 : index
    %c0_37 = arith.constant 0 : index
    %76 = vector.load %arg15[%c0_35, %c0_36, %c0_37] : memref<1x4x64xf32, #tpu.memory_space<vmem>>, vector<1x4x64xf32>
    %77 = vector.shape_cast %76 : vector<1x4x64xf32> to vector<4x64xf32>
    %78 = vector.shape_cast %75 : vector<4x64xf32> to vector<1x4x64xf32>
    tpu.vector_store %arg15[%c0_35, %c0_36, %c0_37], %78 {strides = array<i32>} : memref<1x4x64xf32, #tpu.memory_space<vmem>>, vector<1x4x64xf32>,
    return
  }
  func.func @transform_0(%arg0: i32) -> (i32, i32, i32) {
    %c0_i32 = arith.constant 0 : i32
    %c0_i32_0 = arith.constant 0 : i32
    %c0_i32_1 = arith.constant 0 : i32
    return %arg0, %c0_i32, %c0_i32_0 : i32, i32, i32
  }
  func.func @transform_1(%arg0: i32) -> (i32, i32) {
    %c0_i32 = arith.constant 0 : i32
    %c0_i32_0 = arith.constant 0 : i32
    %c0_i32_1 = arith.constant 0 : i32
    return %c0_i32, %c0_i32_0 : i32, i32
  }
  func.func @transform_2(%arg0: i32) -> (i32, i32) {
    %c0_i32 = arith.constant 0 : i32
    %c0_i32_0 = arith.constant 0 : i32
    %c0_i32_1 = arith.constant 0 : i32
    return %c0_i32, %c0_i32_0 : i32, i32
  }
  func.func @transform_3(%arg0: i32) -> (i32, i32) {
    %c0_i32 = arith.constant 0 : i32
    %c0_i32_0 = arith.constant 0 : i32
    %c0_i32_1 = arith.constant 0 : i32
    return %c0_i32, %c0_i32_0 : i32, i32
  }
  func.func @transform_4(%arg0: i32) -> (i32, i32) {
    %c0_i32 = arith.constant 0 : i32
    %c0_i32_0 = arith.constant 0 : i32
    %c0_i32_1 = arith.constant 0 : i32
    return %c0_i32, %c0_i32_0 : i32, i32
  }
  func.func @transform_5(%arg0: i32) -> (i32, i32) {
    %c0_i32 = arith.constant 0 : i32
    %c0_i32_0 = arith.constant 0 : i32
    %c0_i32_1 = arith.constant 0 : i32
    return %c0_i32, %c0_i32_0 : i32, i32
  }
  func.func @transform_6(%arg0: i32) -> (i32, i32) {
    %c0_i32 = arith.constant 0 : i32
    %c0_i32_0 = arith.constant 0 : i32
    %c0_i32_1 = arith.constant 0 : i32
    return %c0_i32, %c0_i32_0 : i32, i32
  }
  func.func @transform_7(%arg0: i32) -> (i32, i32) {
    %c0_i32 = arith.constant 0 : i32
    %c0_i32_0 = arith.constant 0 : i32
    %c0_i32_1 = arith.constant 0 : i32
    return %c0_i32, %c0_i32_0 : i32, i32
  }
  func.func @transform_8(%arg0: i32) -> (i32, i32) {
    %c0_i32 = arith.constant 0 : i32
    %c0_i32_0 = arith.constant 0 : i32
    %c0_i32_1 = arith.constant 0 : i32
    return %c0_i32, %c0_i32_0 : i32, i32
  }
  func.func @transform_9(%arg0: i32) -> (i32, i32) {
    %c0_i32 = arith.constant 0 : i32
    %c0_i32_0 = arith.constant 0 : i32
    %c0_i32_1 = arith.constant 0 : i32
    return %c0_i32, %c0_i32_0 : i32, i32
  }
  func.func @transform_10(%arg0: i32) -> (i32, i32) {
    %c0_i32 = arith.constant 0 : i32
    %c0_i32_0 = arith.constant 0 : i32
    %c0_i32_1 = arith.constant 0 : i32
    return %c0_i32, %c0_i32_0 : i32, i32
  }
  func.func @transform_11(%arg0: i32) -> (i32, i32) {
    %c0_i32 = arith.constant 0 : i32
    %c0_i32_0 = arith.constant 0 : i32
    %c0_i32_1 = arith.constant 0 : i32
    return %c0_i32, %c0_i32_0 : i32, i32
  }
  func.func @transform_12(%arg0: i32) -> (i32, i32) {
    %c0_i32 = arith.constant 0 : i32
    %c0_i32_0 = arith.constant 0 : i32
    %c0_i32_1 = arith.constant 0 : i32
    return %c0_i32, %c0_i32_0 : i32, i32
  }
  func.func @transform_13(%arg0: i32) -> (i32, i32, i32) {
    %c0_i32 = arith.constant 0 : i32
    %c0_i32_0 = arith.constant 0 : i32
    %c0_i32_1 = arith.constant 0 : i32
    return %arg0, %c0_i32, %c0_i32_0 : i32, i32, i32
  }
  func.func @transform_14(%arg0: i32) -> (i32, i32, i32) {
    %c0_i32 = arith.constant 0 : i32
    %c0_i32_0 = arith.constant 0 : i32
    %c0_i32_1 = arith.constant 0 : i32
    return %arg0, %c0_i32, %c0_i32_0 : i32, i32, i32
  }
}

</mosaic_0001>

<bundles_post_ra>
// kernel: tpu_custom_call.1
= control target key start
LH: loop header
LB: loop body
LE: loop exit
PB: predicated region body
PF: predicated region fallthrough
CT: control target
= control target key end

     0   :  { %s1889_s0 = inlined_call_operand.vmem [shape: f32[2,4,256], index: 0, kind: input, shape index: {}]   ;;  %s1890_s1 = inlined_call_operand.vmem [shape: f32[4,1], index: 1, kind: input, shape index: {}]   ;;  %s1891_s2 = inlined_call_operand.vmem [shape: f32[4,1], index: 2, kind: input, shape index: {}]   ;;  %s1892_s3 = inlined_call_operand.vmem [shape: f32[2,4], index: 3, kind: input, shape index: {}]   ;;  %s1893_s4 = inlined_call_operand.vmem [shape: f32[2,1], index: 4, kind: input, shape index: {}]   ;;  %s1894_s5 = inlined_call_operand.vmem [shape: f32[2,1], index: 5, kind: input, shape index: {}]   ;;  %s1895_s6 = inlined_call_operand.vmem [shape: f32[2,18], index: 6, kind: input, shape index: {}]   ;;  %s1896_s7 = inlined_call_operand.vmem [shape: f32[2,1], index: 7, kind: input, shape index: {}]   ;;  %s1897_s8 = inlined_call_operand.vmem [shape: f32[2,1], index: 8, kind: input, shape index: {}]   ;;  %s1898_s9 = inlined_call_operand.vmem [shape: f32[4,2], index: 9, kind: input, shape index: {}]   ;;  %s1899_s10 = inlined_call_operand.vmem [shape: f32[4,1], index: 10, kind: input, shape index: {}]   ;;  %s1900_s11 = inlined_call_operand.vmem [shape: f32[18,256], index: 11, kind: input, shape index: {}]   ;;  %s1901_s12 = inlined_call_operand.vmem [shape: f32[256,64], index: 12, kind: input, shape index: {}]   ;;  %s1902_s13 = inlined_call_operand.hbm [shape: f32[2,4,256], index: 13, kind: output, shape index: {0}]   ;;  %s1903_s14 = inlined_call_operand.hbm [shape: f32[2,4,64], index: 14, kind: output, shape index: {1}]  }
   0x1   :  { %1906 = sst [smem:[#allocation8_spill]] %s1889_s0 }
   0x2   :  { %1907 = sst [smem:[#allocation9_spill]] %s1890_s1 }
   0x3   :  { %1908 = sst [smem:[#allocation10_spill]] %s1891_s2 }
   0x4   :  { %1909 = sst [smem:[#allocation11_spill]] %s1892_s3 }
   0x5   :  { %1910 = sst [smem:[#allocation12_spill]] %s1893_s4 }
   0x6   :  { %20 = vsyncpa [#allocation3], 0 }
   0x7   :  { %22 = vsyncpa [#allocation3 + $0x1], 0 }
   0x8   :  { %23 = vsyncpa [#allocation5], 0 }
   0x9   :  { %25 = vsyncpa [#allocation5 + $0x1], 0  ;;  %s1539_s29 = smov 0   ;;  %s1541_s30 = smov 0  }
   0xa   :  { %s1543_s15 = smov 0   ;;  %s1545_s16 = smov 0  }
   0xb LB: > { %s1560_s17 = sadd.s32 4294967295, %s1449_s16   ;;  %s1190_s18 = sadd.s32 4294967294, %s1449_s16   ;;  %s1449_s16 = sphi %s1545_s16, %s1923_s16   ;;  %s1445_s15 = sphi %s1543_s15, %s1922_s15   ;;  %s1441_s30 = sphi %s1541_s30, %s1921_s30   ;;  %s1437_s29 = sphi %s1539_s29, %s1920_s29  }
   0xc   : > { %s1564_s19 = sadd.s32 1, %s1449_s16   ;;  %s316_s20 = sadd.s32 1, %s1445_s15 }
   0xd   : > { %s313_s21 = ssub.s32 %s1449_s16, %s1564_s19  ;;  %p326_p0 = scmp.ne.s32.totalorder %s1445_s15, %s1441_s30 }
   0xe   : > { %p314_p1 = scmp.eq.s32.totalorder %s313_s21, 0  ;;  %p327_p2 = scmp.eq.s32.totalorder %s1560_s17, 1 }
   0xf   : > { %p332_p3 = scmp.ne.s32.totalorder %s1441_s30, %s1437_s29  ;;  %p333_p4 = scmp.eq.s32.totalorder %s1190_s18, 1 }
  0x10   : > { %s1575_s22 = scalar_select %p314_p1, %s1445_s15, %s316_s20  }
  0x11   : > { %p1577_p5 = por %p327_p2, %p326_p0  ;;  %p1581_p6 = por %p333_p4, %p332_p3 }
  0x12   : > { %p1193_p7 = scmp.ge.s32.totalorder %s1449_s16, 1  ;;  %p421_p8 = scmp.lt.s32.totalorder %s1449_s16, 3 }
  0x14   : > { %p422_p9 = pnand %p1193_p7, %p421_p8 }
  0x15   : > { %s1913_s1 = sld [smem:[#allocation9_spill]] (!%p422_p9)  ;;  %v1451_v1 = vmov (!%p422_p9), 0   ;;  %s1914_s2 = sld [smem:[#allocation10_spill]] (!%p422_p9)  ;;  %v1452_v3 = vmov (!%p422_p9), 0.0   ;;  %v598_v5 = vld [vmem:[%s1894_s5] sm:$0x3] (!%p422_p9)  ;;  %v486_v8 = vlaneseq (!%p422_p9) }
  0x16   : > { %425 = sbr.rel (%p422_p9) target bundleno = 1453 (0x5ad), region = 72  ;;  %1342 = vset.pattern.permute.xlu0 (!%p422_p9), %v1451_v1  ;;  %1343 = vset.pattern.permute.xlu1 (!%p422_p9), %v1451_v1  ;;  %s1915_s4 = sld [smem:[#allocation12_spill]] (!%p422_p9)  ;;  %v1453_v6 = vmov (!%p422_p9), 839922192   ;;  %vm514_vm0 = vcmask (!%p422_p9), 1043456   ;;  %vm510_vm1 = vcmask (!%p422_p9), 31744  }
  0x17   : > { %583 = vmatprep.mubr.f32.mxu1 (!%p422_p9), %v1452_v3  ;;  %p472_p10 = scmp.lt.s32.totalorder (!%p422_p9), %s1560_s17, 1  ;;  %v484_v7 = vunpack.c.l.s4 (!%p422_p9), %v1453_v6  ;;  %v487_v10 = vshrl.u32 (!%p422_p9), %v486_v8, 7  ;;  %s1916_s0 = sld [smem:[#allocation8_spill]] (!%p422_p9)  ;;  %v830_v32 = vld [vmem:[%s1897_s8] sm:$0x3] (!%p422_p9)  ;;  %vm625_vm2 = vcmask (!%p422_p9), 130048  }
  0x18   : > { %s1917_s3 = sld [smem:[#allocation11_spill]] (!%p422_p9)  ;;  %s1455_s25 = smov (!%p422_p9), 16   ;;  %v822_v33 = vld [vmem:[%s1896_s7] sm:$0x3] (!%p422_p9)  ;;  %vm651_vm3 = vcmask (!%p422_p9), 1039360   ;;  %vm615_vm4 = vcmask (!%p422_p9), 138240  }
  0x19   : > { %v485_v9 = vunpack.c.0.s8 (!%p422_p9), %v484_v7  ;;  %s1458_s28 = smov (!%p422_p9), 17   ;;  %s1905_s20 = smov (!%p422_p9), 112   ;;  %v841_v34 = vld [vmem:[%s1899_s10] sm:$0xf] (!%p422_p9)  ;;  %vm634_vm5 = vcmask (!%p422_p9), 121856   ;;  %vm714_vm6 = vcmask (!%p422_p9), 1041408  }
  0x1a   : > { %s1461_s21 = smov (!%p422_p9), 111   ;;  %vm660_vm7 = vcmask (!%p422_p9), 924672   ;;  %vm643_vm8 = vcmask (!%p422_p9), 7168   ;;  %vm669_vm9 = vcmask (!%p422_p9), 916480   ;;  %vm719_vm10 = vcmask (!%p422_p9), 1045504  }
  0x1b   : > { %v478_v0 = vld [vmem:[%s1913_s1] sm:$0xf] (!%p422_p9)  ;;  %v488_v11 = vsub.s32 (!%p422_p9), %v485_v9, %v487_v10  ;;  %s1904_s1 = smov (!%p422_p9), 127   ;;  %vm678_vm11 = vcmask (!%p422_p9), 908288   ;;  %vm741_vm12 = vcmask (!%p422_p9), 146432   ;;  %vm847_vm13 = vcmask (!%p422_p9), 15360  }
  0x1c   : > { %481 = vperm.xlu0 (!%p422_p9), %1342, %v478_v0   ;;  %v492_v2 = vld [vmem:[%s1914_s2] sm:$0xf] (!%p422_p9) }
  0x1d   : > { %v590_v4 = vld [vmem:[%s1915_s4] sm:$0x3]  ;;  %s473_s26 = scalar_select %p472_p10, %s1560_s17, 1 }
  0x1e   : > { %593 = vperm.xlu1 %1343, %v590_v4   ;;  %v507_v21 = vld [vmem:[%s1917_s3] sm:$0x3] }
  0x1f   : > { %s1214_s27 = sshll.u32 %s473_s26, 3  ;;  %s1456_s26 = smov 113  }
  0x20   : > { %495 = vperm.xlu0 %1342, %v492_v2   ;;  %s476_s18 = scalar_lea.vmem %s1916_s0, %s1214_s27  ;;  %s1457_s27 = smov 15  }
  0x21   : > { %v1605_v14 = vld [vmem:[%s476_s18] sm:$0xff]  ;;  %s1459_s18 = smov 1   ;;  %s1215_s0 = sshll.u32 %s1560_s17, 7 }
  0x22   : > { %601 = vperm.xlu1 %1343, %v598_v5   ;;  %s1820_s4 = scalar_lea.hbm %s1902_s13, %s1215_s0 }
  0x9b   : > { %v482_v12 = vpop.permute.xlu0 %481 }
  0x9c   : > { %v489_v13 = vrot.slane %v482_v12, %v488_v11 }
  0x9d   : > { %v594_v22 = vpop.permute.xlu1 %593 }
  0x9e   : > { %v491_v16 = vmul.f32 %v489_v13, %v1605_v14 }
  0x9f   : > { %v496_v15 = vpop.permute.xlu0 %495 }
  0xa0   : > { %v503_v17 = vrot.slane %v496_v15, %v488_v11  ;;  %v728_v15 = vld [vmem:[%s1900_s11] sm:$0xff] }
  0xa1   : > { %v602_v26 = vpop.permute.xlu1 %601 }
  0xa2   : > { %v505_v18 = vadd.f32 %v503_v17, %v491_v16 }
  0xa4   : > { %v506_v19 = vmax.f32 %v505_v18, 0.0 }
  0xa6   : > { %v509_v20 = vcombine.high %v506_v19, %v506_v19 }
  0xa8   : > { %1198 = vmatprep.subr.msk.mxu1 %vm514_vm0, %v509_v20  ;;  %v730_v20 = vld [vmem:[%s1900_s11 + $0x10] sm:$0xff] }
  0xa9   : > { %1199 = vmatpush1.msk.msra.mxu1 %vm514_vm0, %v506_v19 }
  0xaa   : > { %1200 = vmatmul.mubr.msk.f32.vlgmr.msra.gmra.mrb[0].mxu1 %vm510_vm1, %v507_v21 }
  0xab   : > { %815 = vmatprep.mubr.f32.mxu1 %v1452_v3 }
 0x17d   : > { %v585_v23 = vpop.f32.mrb[0].mxu1 }
 0x17e   : > { %v596_v24 = vmul.f32 %v594_v22, %v585_v23  ;;  %v587_v25 = vpop.f32.mrb[1].mxu1  ;;  %v729_v23 = vld [vmem:[%s1900_s11 + $0x8] sm:$0xff] }
 0x17f   : > { %v597_v29 = vmul.f32 %v594_v22, %v587_v25 }
 0x180   : > { %v604_v27 = vadd.f32 %v602_v26, %v596_v24  ;;  %v731_v24 = vld [vmem:[%s1900_s11 + $0x18] sm:$0xff] }
 0x181   : > { %v605_v30 = vadd.f32 %v602_v26, %v597_v29 }
 0x182   : > { %v1614_v28 = vmax.f32 %v604_v27, 0.0 }
 0x183   : > { %v1621_v31 = vmax.f32 %v605_v30, 0.0 }
 0x184   : > { %647 = vrot.lane.b32.xlu0 %v1614_v28, %s1904_s1  ;;  %623 = vrot.lane.b32.xlu1 %v1614_v28, %s1455_s25 }
 0x188   : > { %656 = vrot.lane.b32.xlu0 %v1614_v28, %s1456_s26  ;;  %632 = vrot.lane.b32.xlu1 %v1614_v28, %s1457_s27 }
 0x18c   : > { %613 = vrot.lane.b32.xlu1 %v1614_v28, %s1458_s28  ;;  %620 = vrot.lane.b32.xlu0 %v1621_v31, %s1455_s25  ;;  %s1695_s25 = sand.u32 1, %s1441_s30  }
 0x190   : > { %641 = vrot.lane.b32.xlu1 %v1614_v28, %s1459_s18  ;;  %629 = vrot.lane.b32.xlu0 %v1621_v31, %s1457_s27 }
 0x194   : > { %649 = vrot.lane.b32.xlu1 %v1621_v31, %s1904_s1  ;;  %609 = vrot.lane.b32.xlu0 %v1621_v31, %s1458_s28  ;;  %s1918_s1 = smov 127  }
 0x198   : > { %658 = vrot.lane.b32.xlu1 %v1621_v31, %s1456_s26  ;;  %638 = vrot.lane.b32.xlu0 %v1621_v31, %s1459_s18  ;;  %s1067_s26 = scalar_lea.sflag [#allocation3], %s1695_s25 }
 0x19c   : > { %667 = vrot.lane.b32.xlu1 %v1621_v31, %s1905_s20  ;;  %665 = vrot.lane.b32.xlu0 %v1614_v28, %s1905_s20  ;;  %s1194_s20 = sshll.u32 %s1695_s25, 3 }
 0x19d   : > { %s1752_s27 = scalar_lea.vmem [#allocation2], %s1194_s20  ;;  %s1919_s20 = smov 112  }
 0x19e   : > { %s1086_s28 = sshll.u32 %s1752_s27, 4  ;;  %s1087_s28 = int_to_ptr.vmem [resolvable:$true] %s1086_s28 }
 0x19f   : > { %s1355_s18 = scalar_lea.vmem %s1087_s28, 128 }
 0x1a0   : > { %676 = vrot.lane.b32.xlu1 %v1621_v31, %s1461_s21  ;;  %674 = vrot.lane.b32.xlu0 %v1614_v28, %s1461_s21  ;;  %p1356_p11 = scmp.ne.s32.totalorder %s1087_s28, %s1355_s18 }
 0x1a2   : > { %p1357_p12 = pnand %p1356_p11, %p1577_p5 }
 0x1a4   : > { %833 = vperm.xlu1 %1343, %v830_v32   ;;  %825 = vperm.xlu0 %1342, %v822_v33   ;;  %p1358_p13 = pneg %p1357_p12 }
 0x1a8   : > { %844 = vperm.xlu0 %1342, %v841_v34  }
 0x1f6   : > { %v648_v35 = vpop.permute.xlu0 %647  ;;  %v624_v36 = vpop.permute.xlu1 %623 }
 0x1fa   : > { %v657_v37 = vpop.permute.xlu0 %656  ;;  %v633_v38 = vpop.permute.xlu1 %632 }
 0x1fe   : > { %v614_v39 = vpop.permute.xlu1 %613  ;;  %v621_v40 = vpop.permute.xlu0 %620 }
 0x1ff   : > { %v626_v43 = vsel %vm625_vm2, %v624_v36, %v621_v40  ;;  %v628_v44 = vsel %vm625_vm2, %v621_v40, %v624_v36 }
 0x200   : > { %v685_v51 = vrot.slane %v628_v44, 6  ;;  %v686_v52 = vrot.slane %v626_v43, 6  ;;  %v740_v43 = vld [vmem:[%s1895_s6] sm:$0x3] }
 0x202   : > { %v642_v41 = vpop.permute.xlu1 %641  ;;  %v630_v42 = vpop.permute.xlu0 %629 }
 0x203   : > { %v635_v53 = vsel %vm634_vm5, %v633_v38, %v630_v42  ;;  %v637_v54 = vsel %vm634_vm5, %v630_v42, %v633_v38 }
 0x204   : > { %v690_v1 = vrot.slane %v637_v54, 4  ;;  %v691_v2 = vrot.slane %v635_v53, 4  ;;  %v840_v54 = vld [vmem:[%s1898_s9] sm:$0xf] }
 0x206   : > { %v650_v45 = vpop.permute.xlu1 %649  ;;  %v610_v46 = vpop.permute.xlu0 %609 }
 0x207   : > { %v652_v47 = vsel %vm651_vm3, %v648_v35, %v650_v45  ;;  %v655_v48 = vsel %vm651_vm3, %v650_v45, %v648_v35  ;;  %v616_v49 = vsel %vm615_vm4, %v614_v39, %v610_v46  ;;  %v619_v50 = vsel %vm615_vm4, %v610_v46, %v614_v39  ;;  %v733_v35 = vld [vmem:[%s1900_s11 + $0x28] sm:$0x3]  ;;  %v732_v39 = vld [vmem:[%s1900_s11 + $0x20] sm:$0x3] }
 0x208   : > { %v700_v55 = vrot.slane %v652_v47, 6  ;;  %v701_v56 = vrot.slane %v655_v48, 6  ;;  %v715_v57 = vsel %vm714_vm6, %v619_v50, %v685_v51  ;;  %v716_v58 = vsel %vm714_vm6, %v616_v49, %v686_v52 }
 0x209   : > { %v717_v8 = vsel %vm514_vm0, %v715_v57, %v690_v1  ;;  %v718_v9 = vsel %vm514_vm0, %v716_v58, %v691_v2  ;;  %v963_v1 = vld [vmem:[%s1901_s12 + $0x8] sm:$0xff]  ;;  %v980_v2 = vld [vmem:[%s1901_s12 + $0x90] sm:$0xff] }
 0x20a   : > { %v659_v59 = vpop.permute.xlu1 %658  ;;  %v639_v60 = vpop.permute.xlu0 %638  ;;  %v722_v12 = vsel %vm714_vm6, %v1614_v28, %v700_v55  ;;  %v723_v13 = vsel %vm714_vm6, %v1621_v31, %v701_v56  ;;  %v929_v56 = vcombine.high %v1605_v14, %v1605_v14 }
 0x20b   : > { %v661_v61 = vsel %vm660_vm7, %v657_v37, %v659_v59  ;;  %v664_v62 = vsel %vm660_vm7, %v659_v59, %v657_v37  ;;  %v644_v63 = vsel %vm643_vm8, %v642_v41, %v639_v60  ;;  %v646_v0 = vsel %vm643_vm8, %v639_v60, %v642_v41  ;;  %v978_v60 = vld [vmem:[%s1901_s12 + $0x80] sm:$0xff] }
 0x20c   : > { %v695_v4 = vrot.slane %v646_v0, 2  ;;  %v696_v5 = vrot.slane %v644_v63, 2  ;;  %v705_v6 = vrot.slane %v661_v61, 4  ;;  %v706_v7 = vrot.slane %v664_v62, 4  ;;  %v979_v61 = vld [vmem:[%s1901_s12 + $0x88] sm:$0xff]  ;;  %v962_v62 = vld [vmem:[%s1901_s12] sm:$0xff] }
 0x20d   : > { %v1255_v0 = vpack.c.bf16 %v979_v61, %v978_v60 }
 0x20e   : > { %v668_v10 = vpop.permute.xlu1 %667  ;;  %v666_v11 = vpop.permute.xlu0 %665  ;;  %v720_v18 = vsel %vm719_vm10, %v717_v8, %v695_v4  ;;  %v721_v19 = vsel %vm719_vm10, %v718_v9, %v696_v5  ;;  %v724_v25 = vsel %vm514_vm0, %v722_v12, %v705_v6  ;;  %v725_v26 = vsel %vm514_vm0, %v723_v13, %v706_v7  ;;  %v981_v4 = vld [vmem:[%s1901_s12 + $0x98] sm:$0xff]  ;;  %v982_v9 = vld [vmem:[%s1901_s12 + $0xa0] sm:$0xff] }
 0x20f   : > { %v670_v16 = vsel %vm669_vm9, %v666_v11, %v668_v10  ;;  %v673_v17 = vsel %vm669_vm9, %v668_v10, %v666_v11  ;;  %v734_v31 = vmul.f32 %v728_v15, %v720_v18  ;;  %v735_v33 = vmul.f32 %v729_v23, %v721_v19  ;;  %v965_v8 = vld [vmem:[%s1901_s12 + $0x18] sm:$0xff]  ;;  %1256 = vmatprep.subr.bf16.mxu0 %v1255_v0  ;;  %v983_v10 = vld [vmem:[%s1901_s12 + $0xa8] sm:$0xff]  ;;  %v984_v18 = vld [vmem:[%s1901_s12 + $0xb0] sm:$0xff] }
 0x210   : > { %v710_v21 = vrot.slane %v670_v16, 2  ;;  %v711_v22 = vrot.slane %v673_v17, 2  ;;  %v1257_v6 = vpack.c.bf16 %v963_v1, %v962_v62  ;;  %v1259_v7 = vpack.c.bf16 %v981_v4, %v980_v2  ;;  %v966_v16 = vld [vmem:[%s1901_s12 + $0x20] sm:$0xff]  ;;  %v967_v17 = vld [vmem:[%s1901_s12 + $0x28] sm:$0xff]  ;;  %v985_v19 = vld [vmem:[%s1901_s12 + $0xb8] sm:$0xff] }
 0x211   : > { %v1263_v15 = vpack.c.bf16 %v983_v10, %v982_v9  ;;  %v969_v23 = vld [vmem:[%s1901_s12 + $0x38] sm:$0xff] }
 0x212   : > { %v726_v27 = vsel %vm719_vm10, %v724_v25, %v710_v21  ;;  %v727_v28 = vsel %vm719_vm10, %v725_v26, %v711_v22  ;;  %v677_v29 = vpop.permute.xlu1 %676  ;;  %v675_v30 = vpop.permute.xlu0 %674  ;;  %1258 = vmatpush3.bf16.msra.mxu0 %v1257_v6  ;;  %v1267_v21 = vpack.c.bf16 %v985_v19, %v984_v18  ;;  %v968_v22 = vld [vmem:[%s1901_s12 + $0x30] sm:$0xff]  ;;  %v987_v25 = vld [vmem:[%s1901_s12 + $0xc8] sm:$0xff] }
 0x213   : > { %v736_v32 = vmul.f32 %v730_v20, %v726_v27  ;;  %v737_v34 = vmul.f32 %v731_v24, %v727_v28  ;;  %v683_v36 = vsel %vm678_vm11, %v677_v29, %v675_v30  ;;  %v679_v40 = vsel %vm678_vm11, %v675_v30, %v677_v29  ;;  %1260 = vmatprep.subr.bf16.mxu0 %v1259_v7  ;;  %v986_v24 = vld [vmem:[%s1901_s12 + $0xc0] sm:$0xff]  ;;  %v971_v29 = vld [vmem:[%s1901_s12 + $0x48] sm:$0xff]  ;;  %v988_v30 = vld [vmem:[%s1901_s12 + $0xd0] sm:$0xff] }
 0x214   : > { %v739_v41 = vmul.f32 %v733_v35, %v683_v36  ;;  %v738_v42 = vmul.f32 %v732_v39, %v679_v40  ;;  %v1265_v20 = vpack.c.bf16 %v967_v17, %v966_v16  ;;  %v1269_v26 = vpack.c.bf16 %v969_v23, %v968_v22  ;;  %v970_v28 = vld [vmem:[%s1901_s12 + $0x40] sm:$0xff]  ;;  %v973_v35 = vld [vmem:[%s1901_s12 + $0x58] sm:$0xff] }
 0x215   : > { %v1251_v37 = vpack.c.bf16 %v737_v34, %v735_v33  ;;  %v1253_v38 = vpack.c.bf16 %v736_v32, %v734_v31  ;;  %v1271_v27 = vpack.c.bf16 %v987_v25, %v986_v24  ;;  %v989_v31 = vld [vmem:[%s1901_s12 + $0xd8] sm:$0xff]  ;;  %v1273_v32 = vpack.c.bf16 %v971_v29, %v970_v28  ;;  %v972_v34 = vld [vmem:[%s1901_s12 + $0x50] sm:$0xff]  ;;  %v990_v36 = vld [vmem:[%s1901_s12 + $0xe0] sm:$0xff] }
 0x216   : > { %v1275_v33 = vpack.c.bf16 %v989_v31, %v988_v30  ;;  %v974_v40 = vld [vmem:[%s1901_s12 + $0x60] sm:$0xff] }
 0x217   : > { %1252 = vmatprep.subr.bf16.mxu1 %v1251_v37  ;;  %v991_v37 = vld [vmem:[%s1901_s12 + $0xe8] sm:$0xff] }
 0x218   : > { %1254 = vmatpush1.bf16.msra.mxu1 %v1253_v38  ;;  %v1277_v38 = vpack.c.bf16 %v973_v35, %v972_v34  ;;  %v1279_v39 = vpack.c.bf16 %v991_v37, %v990_v36 }
 0x219   : > { %1201 = vmatprep.subr.msk.mxu1 %vm714_vm6, %v739_v41  ;;  %v975_v41 = vld [vmem:[%s1901_s12 + $0x68] sm:$0xff] }
 0x21c   : > { %1202 = vmatpush1.msk.msra.mxu1 %vm714_vm6, %v738_v42  ;;  %v1281_v42 = vpack.c.bf16 %v975_v41, %v974_v40 }
 0x21d   : > { %1203 = vmatmul.mubr.msk.f32.vlgmr.msra.gmra.mrb[2].mxu1 %vm741_vm12, %v740_v43  ;;  %v992_v43 = vld [vmem:[%s1901_s12 + $0xf0] sm:$0xff] }
 0x21e   : > { %921 = vmatprep.mubr.f32.mxu1 %v1452_v3 }
 0x223   : > { %v826_v44 = vpop.permute.xlu0 %825  ;;  %v834_v48 = vpop.permute.xlu1 %833 }
 0x227   : > { %v845_v3 = vpop.permute.xlu0 %844 }
 0x2f0   : > { %v817_v45 = vpop.f32.mrb[2].mxu1 }
 0x2f1   : > { %v828_v46 = vmul.f32 %v826_v44, %v817_v45  ;;  %v819_v47 = vpop.f32.mrb[3].mxu1 }
 0x2f2   : > { %v829_v49 = vmul.f32 %v826_v44, %v819_v47  ;;  %v993_v44 = vld [vmem:[%s1901_s12 + $0xf8] sm:$0xff] }
 0x2f3   : > { %v836_v50 = vadd.f32 %v834_v48, %v828_v46  ;;  %v1283_v45 = vpack.c.bf16 %v993_v44, %v992_v43  ;;  %v976_v46 = vld [vmem:[%s1901_s12 + $0x70] sm:$0xff]  ;;  %v977_v47 = vld [vmem:[%s1901_s12 + $0x78] sm:$0xff] }
 0x2f4   : > { %v837_v51 = vadd.f32 %v834_v48, %v829_v49  ;;  %v1285_v48 = vpack.c.bf16 %v977_v47, %v976_v46 }
 0x2f5   : > { %v838_v53 = vmax.f32 %v836_v50, 0.0 }
 0x2f6   : > { %v839_v52 = vmax.f32 %v837_v51, 0.0 }
 0x2f8   : > { %1204 = vmatprep.subr.msk.mxu1 %vm714_vm6, %v839_v52 }
 0x2f9   : > { %1205 = vmatpush1.msk.msra.mxu1 %vm714_vm6, %v838_v53 }
 0x2fa   : > { %1206 = vmatmul.mubr.msk.f32.vlgmr.msra.gmra.mrb[4].mxu1 %vm847_vm13, %v840_v54 }
 0x3cd   : > { %v923_v55 = vpop.f32.mrb[4].mxu1 }
 0x3ce   : > { %v924_v57 = vadd.f32 %v923_v55, %v845_v3  ;;  %v925_v58 = vpop.f32.mrb[5].mxu1 }
 0x3cf   : > { %v926_v59 = vadd.f32 %v925_v58, %v845_v3 }
 0x3d0   : > { %v1710_v63 = vadd.f32 %v924_v57, %v1605_v14  ;;  %v964_v14 = vld [vmem:[%s1901_s12 + $0x10] sm:$0xff] }
 0x3d1   : > { %v1721_v5 = vadd.f32 %v929_v56, %v926_v59  ;;  %v1261_v12 = vpack.c.bf16 %v965_v8, %v964_v14 }
 0x3d3   : > { %v1344_v11 = vpack.i.bf16 %v1721_v5, %v1710_v63  ;;  %v935_v13 = vcombine.low %v1710_v63, %v1721_v5  ;;  %1262 = vmatpush3.bf16.msra.mxu0 %v1261_v12 }
 0x3d4   : > { %1264 = vmatprep.subr.bf16.mxu0 %v1263_v15 }
 0x3d5   : > { %1345 = vrot.lane.b32.xlu1 %v1344_v11, %s1918_s1  ;;  %937 = vst [vmem:[%s1752_s27] sm:$0xff] %v935_v13  ;;  %s1462_s1 = smov [#allocation2]  }
 0x3d6   : > { %s1359_s21 = sshll.u32 %s1462_s1, 4  ;;  %s1360_s21 = int_to_ptr.vmem [resolvable:$false] %s1359_s21 }
 0x3d7   : > { %1266 = vmatpush3.bf16.msra.mxu0 %v1265_v20  ;;  %p1362_p0 = scmp.lt.s32.totalorder %s1087_s28, %s1360_s21 }
 0x3d8   : > { %1268 = vmatprep.subr.bf16.mxu0 %v1267_v21 }
 0x3db   : > { %1270 = vmatpush3.bf16.msra.mxu0 %v1269_v26 }
 0x3dc   : > { %1272 = vmatprep.subr.bf16.mxu0 %v1271_v27 }
 0x3df   : > { %1274 = vmatpush3.bf16.msra.mxu0 %v1273_v32 }
 0x3e0   : > { %1276 = vmatprep.subr.bf16.mxu0 %v1275_v33 }
 0x3e3   : > { %1278 = vmatpush3.bf16.msra.mxu0 %v1277_v38 }
 0x3e4   : > { %1280 = vmatprep.subr.bf16.mxu0 %v1279_v39 }
 0x3e7   : > { %1282 = vmatpush3.bf16.msra.mxu0 %v1281_v42 }
 0x3e8   : > { %1284 = vmatprep.subr.bf16.mxu0 %v1283_v45 }
 0x3eb   : > { %1286 = vmatpush3.bf16.msra.mxu0 %v1285_v48 }
 0x447   : > { %v1346_v49 = vpop.permute.xlu1 %1345 }
 0x448   : > { %v1348_v50 = vunpack.i.h.bf16 %v1346_v49  ;;  %v1347_v51 = vunpack.i.l.bf16 %v1346_v49 }
 0x44a   : > { %v942_v52 = vsel %vm651_vm3, %v1347_v51, %v1348_v50  ;;  %v946_v53 = vsel %vm651_vm3, %v1348_v50, %v1347_v51 }
 0x44b   : > { %v947_v54 = vmax.f32 %v1710_v63, %v942_v52  ;;  %v948_v3 = vmax.f32 %v1721_v5, %v946_v53 }
 0x44d   : > { %v1349_v55 = vpack.i.bf16 %v948_v3, %v947_v54 }
 0x44f   : > { %1350 = vrot.lane.b32.xlu0 %v1349_v55, %s1919_s20  ;;  %s1361_s20 = scalar_lea.vmem %s1360_s21, 256 }
 0x450   : > { %p1363_p1 = scmp.lt.s32.totalorder %s1361_s20, %s1355_s18 }
 0x452   : > { %p1364_p2 = por %p1363_p1, %p1362_p0 }
 0x454   : > { %p1365_p3 = pnand %p1364_p2, %p1358_p13 }
 0x4c1   : > { %v1351_v56 = vpop.permute.xlu0 %1350 }
 0x4c2   : > { %v1353_v57 = vunpack.i.h.bf16 %v1351_v56  ;;  %v1352_v58 = vunpack.i.l.bf16 %v1351_v56 }
 0x4c4   : > { %v959_v59 = vsel %vm669_vm9, %v1353_v57, %v1352_v58  ;;  %v955_v60 = vsel %vm669_vm9, %v1352_v58, %v1353_v57 }
 0x4c5   : > { %v961_v61 = vmax.f32 %v948_v3, %v959_v59  ;;  %v960_v62 = vmax.f32 %v947_v54, %v955_v60 }
 0x4c7   : > { %1058 = vmatprep.mubr.f32.mxu0 %v961_v61 }
 0x4c8   : > { %1059 = vmatmul.mubr.f32.vlgmr.msra.gmra.mrb[0].mxu0 %v960_v62 }
 0x4c9   : > { %1368 = shalt.err (!%p1365_p3)
}
 0x4ca   : > { %s1369_s27 = scalar_lea.hbm %s1820_s4, 128  ;;  %s1373_s3 = scalar_lea.hbm %s1902_s13, 256 }
 0x4cb   : > { %p1370_p4 = scmp.ne.s32.totalorder %s1820_s4, %s1369_s27  ;;  %p1374_p9 = scmp.lt.u32.totalorder %s1820_s4, %s1902_s13 }
 0x4cc   : > { %p1375_p10 = scmp.lt.u32.totalorder %s1373_s3, %s1369_s27  ;;  %p1377_p12 = scmp.lt.u32.totalorder %s1369_s27, %s1820_s4 }
 0x4cd   : > { %p1371_p7 = pnand %p1370_p4, %p1577_p5 }
 0x4ce   : > { %p1376_p11 = por %p1375_p10, %p1374_p9 }
 0x4cf   : > { %p1372_p8 = pneg %p1371_p7 }
 0x4d0   : > { %p1378_p13 = por %p1377_p12, %p1376_p11 }
 0x4d2   : > { %p1379_p0 = pnand %p1378_p13, %p1372_p8 }
 0x4d4   : > { %1382 = shalt.err (!%p1379_p0)
}
 0x4d5   : > { %1287 = dma.vmem_to_hbm [thread:$0]  (%p1577_p5), %s1087_s28, 128, %s1820_s4, %s1067_s26   ;;  %vm1064_vm14 = vcmask 519168  }
 0x4d6   : > { %s1195_s18 = sshll.u32 %s1695_s25, 2  ;;  %s1211_s20 = sshll.u32 %s1560_s17, 6 }
 0x4d7   : > { %s471_s0 = scalar_lea.vmem [#allocation4], %s1195_s18  ;;  %s1846_s1 = scalar_lea.hbm %s1903_s14, %s1211_s20 }
 0x4d8   : > { %s1099_s2 = sshll.u32 %s471_s0, 4  ;;  %s1072_s4 = scalar_lea.sflag [#allocation5], %s1695_s25  ;;  %s1848_s2 = int_to_ptr.vmem [resolvable:$true] %s1099_s2 }
 0x4d9   : > { %s1383_s28 = scalar_lea.vmem %s1848_s2, 64  ;;  %s1463_s17 = smov [#allocation4]  }
 0x4da   : > { %p1384_p1 = scmp.ne.s32.totalorder %s1848_s2, %s1383_s28  ;;  %s1387_s26 = sshll.u32 %s1463_s17, 4  ;;  %s1388_s26 = int_to_ptr.vmem [resolvable:$false] %s1387_s26 }
 0x4db   : > { %s1389_s21 = scalar_lea.vmem %s1388_s26, 128  ;;  %p1390_p4 = scmp.lt.s32.totalorder %s1848_s2, %s1388_s26 }
 0x4dc   : > { %p1385_p2 = pnand %p1384_p1, %p1577_p5  ;;  %p1391_p7 = scmp.lt.s32.totalorder %s1389_s21, %s1383_s28 }
 0x4de   : > { %p1386_p3 = pneg %p1385_p2  ;;  %p1392_p8 = por %p1391_p7, %p1390_p4 }
 0x4e0   : > { %p1393_p9 = pnand %p1392_p8, %p1386_p3 }
 0x59b   : > { %v1248_v63 = vpop.f32.mrb[0].mxu0 }
 0x59c   : > { %v1249_v0 = vpop.f32.mrb[1].mxu0 }
 0x59d   : > { %v1250_v1 = vadd.f32 %v1249_v0, %v1248_v63 }
 0x59f   : > { %1065 = vst.msk [vmem:[%s471_s0] sm:$0xf] %vm1064_vm14, %v1250_v1 }
 0x5a0   : > { %1396 = shalt.err (!%p1393_p9)
}
 0x5a1   : > { %s1397_s25 = scalar_lea.hbm %s1846_s1, 64  ;;  %s1401_s0 = scalar_lea.hbm %s1903_s14, 128 }
 0x5a2   : > { %p1398_p10 = scmp.ne.s32.totalorder %s1846_s1, %s1397_s25  ;;  %p1402_p13 = scmp.lt.u32.totalorder %s1846_s1, %s1903_s14 }
 0x5a3   : > { %p1403_p0 = scmp.lt.u32.totalorder %s1401_s0, %s1397_s25  ;;  %p1405_p2 = scmp.lt.u32.totalorder %s1397_s25, %s1846_s1 }
 0x5a4   : > { %p1399_p11 = pnand %p1398_p10, %p1577_p5 }
 0x5a5   : > { %p1404_p1 = por %p1403_p0, %p1402_p13 }
 0x5a6   : > { %p1400_p12 = pneg %p1399_p11 }
 0x5a7   : > { %p1406_p3 = por %p1405_p2, %p1404_p1 }
 0x5a9   : > { %p1407_p4 = pnand %p1406_p3, %p1400_p12 }
 0x5ab   : > { %1410 = shalt.err (!%p1407_p4)
}
 0x5ac   : > { %1288 = dma.vmem_to_hbm [thread:$0]  (%p1577_p5), %s1848_s2, 64, %s1846_s1, %s1072_s4  }
 0x5ad PF: > { %p1298_p7 = scmp.ge.s32.totalorder %s1449_s16, 2  ;;  %s1111_s28 = sand.u32 1, %s1437_s29  }
 0x5ae   : > { %s1112_s17 = scalar_lea.sflag [#allocation3], %s1111_s28 }
 0x5af   : > { %p1292_p8 = pnand %p1298_p7, %p1581_p6 }
 0x5b1   : > { %1428 = dma.done.wait (!%p1292_p8), %s1112_s17, 128  }
 0x5b2   : > { %1430 = vsyncadd (!%p1292_p8), %s1112_s17, 4294967168  ;;  %s1121_s26 = scalar_lea.sflag [#allocation5], %s1111_s28 }
 0x5b3   : > { %1432 = dma.done.wait (!%p1292_p8), %s1121_s26, 64  }
 0x5b4   : > { %1434 = vsyncadd (!%p1292_p8), %s1121_s26, 4294967232  ;;  %p28_p5 = scmp.ge.s32.totalorder %s1564_s19, 4   ;;  %s1920_s29 = smov %s1441_s30 }
 0x5b5   : > { %s1921_s30 = smov %s1445_s15  ;;  %s1922_s15 = smov %s1575_s22 }
 0x5b6   : > { %s1923_s16 = smov %s1564_s19  ;;  %30 = sbr.rel (!%p28_p5) target bundleno = 11 (0xb), region = 124 }
 0x5bd   :  { %1126 = vsyncpa [#allocation3], 1 }
 0x5be   :  { %1128 = vsyncpa [#allocation3 + $0x1], 1 }
 0x5bf   :  { %1129 = vsyncpa [#allocation5], 1 }
 0x5c0   :  { %1131 = vsyncpa [#allocation5 + $0x1], 1 }

</bundles_post_ra>
